<compile_context>
chip_gen: v7x
topology: tpu7x:2x2x1
jax: 0.10.0
libtpu: 0.0.40
codegen_flags: <defaults>
</compile_context>

<pallas_src>
import functools

import jax
import jax.numpy as jnp
from jax.experimental import pallas as pl
from jax.experimental.pallas import tpu as pltpu


# Tap order (kh-major, kw-minor) shared by kernel, masks and weight reordering.
_TAPS = tuple((kh - 1, kw - 1) for kh in range(3) for kw in range(3))


def _round_up(x, m):
    return (x + m - 1) // m * m


def _pick_batch_tile(N, HW):
    """Images per grid step: ~2048 lanes/step, but keep >=2 steps for v7x."""
    target = max(1, 2048 // HW)
    if N >= 2:
        target = min(target, N // 2)   # two v7x TensorCores need >= 2 parallel steps
    target = max(1, min(target, N))
    nb = 1
    for d in range(1, target + 1):     # largest divisor of N <= target (exact grid)
        if N % d == 0:
            nb = d
    return nb


def _fused_conv_block_kernel(x_ref, m_ref, w1_ref, b1_ref, w2_ref, b2_ref,
                             o_ref, p1_ref, p2_ref, *, H, W, Nb, Cp):
    """Fused conv3x3+ReLU -> conv3x3+ReLU for Nb images.

    x_ref : (Nb, Cp, HW)      f32 input, channels on sublanes, spatial on lanes
    m_ref : (9, Cp, Nb*HW)    f32 0/1 tap-validity masks (pre-broadcast, col%HW)
    w1_ref: (Cp, 9*Cp) bf16   layer-1 weights (rows >= F are zero)
    b1_ref: (Cp, 1)    f32    layer-1 bias    (rows >= F are zero)
    w2_ref: (F, 9*Cp)  bf16   layer-2 weights
    b2_ref: (F, 1)     f32    layer-2 bias
    o_ref : (Nb, F, HW) f32   output (lane-dense, NCHW-flat)
    p1_ref, p2_ref: (9*Cp, Nb*HW) f32 VMEM im2col patch scratch (one per layer)
    """
    HW = H * W

    # ---- layer-1 im2col: masked lane-rolls -> VMEM patch scratch ----------
    for i in range(Nb):
        xi = x_ref[i]                                            # (Cp, HW) f32
        for t, (dh, dw) in enumerate(_TAPS):
            off = dh * W + dw
            if off == 0:
                tap = xi                                         # center tap: all valid
            else:
                # roll(x,-off)[:,col] = x[:,col+off]; invalid taps multiplied to 0
                tap = jnp.roll(xi, -off, axis=1) * m_ref[t, :, :HW]
            p1_ref[pl.ds(t * Cp, Cp), pl.ds(i * HW, HW)] = tap

    # Layer 1 = ONE MXU matmul: (Cp, 9Cp) x (9Cp, Nb*HW), bf16 in / f32 acc.
    y1 = jnp.dot(w1_ref[...], p1_ref[...].astype(jnp.bfloat16),
                 preferred_element_type=jnp.float32)
    y1 = jnp.maximum(y1 + b1_ref[...], 0.0)          # (Cp, Nb*HW); rows >= F are 0

    # ---- layer-2 im2col straight off the on-chip activation ---------------
    for t, (dh, dw) in enumerate(_TAPS):
        off = dh * W + dw
        if off == 0:
            tap = y1
        else:
            tap = jnp.roll(y1, -off, axis=1) * m_ref[t]          # per-image masks
        p2_ref[pl.ds(t * Cp, Cp), :] = tap

    y2 = jnp.dot(w2_ref[...], p2_ref[...].astype(jnp.bfloat16),
                 preferred_element_type=jnp.float32)
    y2 = jnp.maximum(y2 + b2_ref[...], 0.0)                      # (F, Nb*HW)

    for i in range(Nb):
        o_ref[i] = y2[:, i * HW:(i + 1) * HW].astype(o_ref.dtype)


@jax.jit
def conv_block_forward(x_nchw, w1, b1, w2, b2):
    """Pallas equivalent of conv_block.forward.

    x_nchw: (N, Cin, H, W); w1: (F, Cin, 3, 3), b1: (F,); w2: (F, F, 3, 3), b2: (F,)
    returns: (N, F, H, W) float32
    """
    N, Cin, H, W = x_nchw.shape
    F = w1.shape[0]
    HW = H * W
    Cp = _round_up(max(Cin, F), 8)          # sublane-aligned channel count
    Nb = _pick_batch_tile(N, HW)            # images per grid step (lane batching)
    steps = N // Nb
    LW = Nb * HW

    # ---- layout glue (all tiny, done once by XLA outside the kernel) ------
    # Input: zero-pad channels to Cp, flatten spatial.
    x_p = jnp.pad(x_nchw, ((0, 0), (0, Cp - Cin), (0, 0), (0, 0)))
    x_p = x_p.reshape(N, Cp, HW).astype(jnp.float32)

    # Weights: (F, C, kh, kw) -> (rows=Cout, cols = tap*Cp + c), zero-padded,
    # pre-cast to bf16 so the kernel feeds the MXU natively.
    w1_r = jnp.transpose(w1, (0, 2, 3, 1))                        # (F, 3, 3, Cin)
    w1_r = jnp.pad(w1_r, ((0, Cp - F), (0, 0), (0, 0), (0, Cp - Cin)))
    w1p = w1_r.reshape(Cp, 9 * Cp).astype(jnp.bfloat16)
    b1p = jnp.pad(b1, (0, Cp - F)).reshape(Cp, 1).astype(jnp.float32)

    w2_r = jnp.transpose(w2, (0, 2, 3, 1))                        # (F, 3, 3, F)
    w2_r = jnp.pad(w2_r, ((0, 0), (0, 0), (0, 0), (0, Cp - F)))
    w2p = w2_r.reshape(F, 9 * Cp).astype(jnp.bfloat16)
    b2c = b2.reshape(F, 1).astype(jnp.float32)

    # Hoisted tap-validity masks, pre-broadcast to Cp sublanes and tiled over
    # the Nb lane-batched images via col % HW (also encodes 'same' zero pad).
    colm = jnp.arange(LW, dtype=jnp.int32) % HW
    hh, ww = colm // W, colm % W
    mask_rows = []
    for dh, dw in _TAPS:
        mask_rows.append((hh + dh >= 0) & (hh + dh < H)
                         & (ww + dw >= 0) & (ww + dw < W))
    masks = jnp.stack(mask_rows)                                  # (9, LW) bool
    masks = jnp.broadcast_to(masks[:, None, :], (9, Cp, LW)).astype(jnp.float32)

    kernel = functools.partial(_fused_conv_block_kernel, H=H, W=W, Nb=Nb, Cp=Cp)

    out_flat = pl.pallas_call(
        kernel,
        out_shape=jax.ShapeDtypeStruct((N, F, HW), jnp.float32),
        grid_spec=pltpu.PrefetchScalarGridSpec(
            num_scalar_prefetch=0,
            grid=(steps,),
            in_specs=[
                pl.BlockSpec((Nb, Cp, HW), lambda n: (n, 0, 0)),   # x (batched)
                pl.BlockSpec((9, Cp, LW), lambda n: (0, 0, 0)),    # masks (const)
                pl.BlockSpec((Cp, 9 * Cp), lambda n: (0, 0)),      # w1 (const)
                pl.BlockSpec((Cp, 1), lambda n: (0, 0)),           # b1 (const)
                pl.BlockSpec((F, 9 * Cp), lambda n: (0, 0)),       # w2 (const)
                pl.BlockSpec((F, 1), lambda n: (0, 0)),            # b2 (const)
            ],
            out_specs=pl.BlockSpec((Nb, F, HW), lambda n: (n, 0, 0)),
            scratch_shapes=[
                pltpu.VMEM((9 * Cp, LW), jnp.float32),             # layer-1 patch
                pltpu.VMEM((9 * Cp, LW), jnp.float32),             # layer-2 patch
            ],
        ),
        compiler_params=pltpu.CompilerParams(
            dimension_semantics=("parallel",),                     # megacore on v7x
        ),
    )(x_p, masks, w1p, b1p, w2p, b2c)

    # (N, F, H*W) is already NCHW-flat; reshape is free.
    return out_flat.reshape(N, F, H, W)


def _reference_forward(x_nchw, w1, b1, w2, b2):
    """Pure-JAX f32 reference using lax.conv (mimics PyTorch Conv2d + ReLU)."""
    dn = ("NCHW", "OIHW", "NCHW")
    y = jax.lax.conv_general_dilated(
        x_nchw, w1, window_strides=(1, 1), padding="SAME",
        dimension_numbers=dn,
    ) + b1[None, :, None, None]
    y = jnp.maximum(y, 0.0)
    y = jax.lax.conv_general_dilated(
        y, w2, window_strides=(1, 1), padding="SAME",
        dimension_numbers=dn,
    ) + b2[None, :, None, None]
    return jnp.maximum(y, 0.0)


if __name__ == "__main__":
    # Deterministic setup consistent with conv_block(in_channels=4, num_filters=8)
    N, Cin, H, W = 2, 4, 16, 16
    F = 8

    key = jax.random.PRNGKey(0)
    kx, kw1, kb1, kw2, kb2 = jax.random.split(key, 5)

    x = jax.random.normal(kx, (N, Cin, H, W), jnp.float32)
    w1 = jax.random.normal(kw1, (F, Cin, 3, 3), jnp.float32) * (2.0 / (Cin * 9)) ** 0.5
    b1 = jax.random.normal(kb1, (F,), jnp.float32) * 0.01
    w2 = jax.random.normal(kw2, (F, F, 3, 3), jnp.float32) * (2.0 / (F * 9)) ** 0.5
    b2 = jax.random.normal(kb2, (F,), jnp.float32) * 0.01

    out = conv_block_forward(x, w1, b1, w2, b2)
    out = jax.block_until_ready(out)

    ref = _reference_forward(x, w1, b1, w2, b2)
    assert out.shape == (N, F, H, W), out.shape
    # bf16 MXU operands with f32 accumulation (per perf review) vs. f32 reference.
    assert jnp.allclose(out, ref, atol=3e-2, rtol=3e-2), float(
        jnp.max(jnp.abs(out - ref))
    )

    print("KERNEL_OK")
</pallas_src>

<mosaic_0001>
module attributes {stable_mosaic.version = 11 : i64} {
  func.func @_fused_conv_block_kernel(%arg0: i32, %arg1: memref<1x8x256xf32, #tpu.memory_space<vmem>>, %arg2: memref<9x8x256xf32, #tpu.memory_space<vmem>>, %arg3: memref<8x72xbf16, #tpu.memory_space<vmem>>, %arg4: memref<8x1xf32, #tpu.memory_space<vmem>>, %arg5: memref<8x72xbf16, #tpu.memory_space<vmem>>, %arg6: memref<8x1xf32, #tpu.memory_space<vmem>>, %arg7: memref<1x8x256xf32, #tpu.memory_space<vmem>>, %arg8: memref<72x256xf32, #tpu.memory_space<vmem>>, %arg9: memref<72x256xf32, #tpu.memory_space<vmem>>) attributes {dimension_semantics = [#tpu.dimension_semantics<parallel>], iteration_bounds = array<i64: 2>, scalar_prefetch = 0 : i64, scratch_operands = 2 : i64, tpu.core_type = #tpu.core_type<tc>, window_params = [{transform_indices = @transform_0, window_bounds = array<i64: 1, 8, 256>}, {pipeline_mode = #tpu.pipeline_mode<synchronous>, transform_indices = @transform_1, window_bounds = array<i64: 9, 8, 256>}, {pipeline_mode = #tpu.pipeline_mode<synchronous>, transform_indices = @transform_2, window_bounds = array<i64: 8, 72>}, {pipeline_mode = #tpu.pipeline_mode<synchronous>, transform_indices = @transform_3, window_bounds = array<i64: 8, 1>}, {pipeline_mode = #tpu.pipeline_mode<synchronous>, transform_indices = @transform_4, window_bounds = array<i64: 8, 72>}, {pipeline_mode = #tpu.pipeline_mode<synchronous>, transform_indices = @transform_5, window_bounds = array<i64: 8, 1>}, {transform_indices = @transform_6, window_bounds = array<i64: 1, 8, 256>}]} {
    %c0 = arith.constant 0 : index
    %c0_0 = arith.constant 0 : index
    %c0_1 = arith.constant 0 : index
    %0 = vector.load %arg1[%c0, %c0_0, %c0_1] : memref<1x8x256xf32, #tpu.memory_space<vmem>>, vector<1x8x256xf32>
    %1 = vector.shape_cast %0 : vector<1x8x256xf32> to vector<8x256xf32>
    %2 = vector.extract_strided_slice %1 {offsets = [0, 239], sizes = [8, 17], strides = [1, 1]} : vector<8x256xf32> to vector<8x17xf32>
    %3 = vector.extract_strided_slice %1 {offsets = [0, 0], sizes = [8, 239], strides = [1, 1]} : vector<8x256xf32> to vector<8x239xf32>
    %4 = tpu.concatenate %2, %3 in 1 : vector<8x17xf32>, vector<8x239xf32> -> vector<8x256xf32>
    %c0_2 = arith.constant 0 : index
    %c0_3 = arith.constant 0 : index
    %c0_4 = arith.constant 0 : index
    %5 = vector.load %arg2[%c0_2, %c0_3, %c0_4] : memref<9x8x256xf32, #tpu.memory_space<vmem>>, vector<1x8x256xf32>
    %6 = vector.shape_cast %5 : vector<1x8x256xf32> to vector<8x256xf32>
    %7 = arith.mulf %4, %6 : vector<8x256xf32>
    %c0_5 = arith.constant 0 : index
    %c0_6 = arith.constant 0 : index
    %8 = vector.load %arg8[%c0_5, %c0_6] : memref<72x256xf32, #tpu.memory_space<vmem>>, vector<8x256xf32>
    tpu.vector_store %arg8[%c0_5, %c0_6], %7 {strides = array<i32>} : memref<72x256xf32, #tpu.memory_space<vmem>>, vector<8x256xf32>,
    %9 = vector.extract_strided_slice %1 {offsets = [0, 240], sizes = [8, 16], strides = [1, 1]} : vector<8x256xf32> to vector<8x16xf32>
    %10 = vector.extract_strided_slice %1 {offsets = [0, 0], sizes = [8, 240], strides = [1, 1]} : vector<8x256xf32> to vector<8x240xf32>
    %11 = tpu.concatenate %9, %10 in 1 : vector<8x16xf32>, vector<8x240xf32> -> vector<8x256xf32>
    %c1 = arith.constant 1 : index
    %c0_7 = arith.constant 0 : index
    %c0_8 = arith.constant 0 : index
    %12 = vector.load %arg2[%c1, %c0_7, %c0_8] : memref<9x8x256xf32, #tpu.memory_space<vmem>>, vector<1x8x256xf32>
    %13 = vector.shape_cast %12 : vector<1x8x256xf32> to vector<8x256xf32>
    %14 = arith.mulf %11, %13 : vector<8x256xf32>
    %c8 = arith.constant 8 : index
    %c0_9 = arith.constant 0 : index
    %15 = vector.load %arg8[%c8, %c0_9] : memref<72x256xf32, #tpu.memory_space<vmem>>, vector<8x256xf32>
    tpu.vector_store %arg8[%c8, %c0_9], %14 {strides = array<i32>} : memref<72x256xf32, #tpu.memory_space<vmem>>, vector<8x256xf32>,
    %16 = vector.extract_strided_slice %1 {offsets = [0, 241], sizes = [8, 15], strides = [1, 1]} : vector<8x256xf32> to vector<8x15xf32>
    %17 = vector.extract_strided_slice %1 {offsets = [0, 0], sizes = [8, 241], strides = [1, 1]} : vector<8x256xf32> to vector<8x241xf32>
    %18 = tpu.concatenate %16, %17 in 1 : vector<8x15xf32>, vector<8x241xf32> -> vector<8x256xf32>
    %c2 = arith.constant 2 : index
    %c0_10 = arith.constant 0 : index
    %c0_11 = arith.constant 0 : index
    %19 = vector.load %arg2[%c2, %c0_10, %c0_11] : memref<9x8x256xf32, #tpu.memory_space<vmem>>, vector<1x8x256xf32>
    %20 = vector.shape_cast %19 : vector<1x8x256xf32> to vector<8x256xf32>
    %21 = arith.mulf %18, %20 : vector<8x256xf32>
    %c16 = arith.constant 16 : index
    %c0_12 = arith.constant 0 : index
    %22 = vector.load %arg8[%c16, %c0_12] : memref<72x256xf32, #tpu.memory_space<vmem>>, vector<8x256xf32>
    tpu.vector_store %arg8[%c16, %c0_12], %21 {strides = array<i32>} : memref<72x256xf32, #tpu.memory_space<vmem>>, vector<8x256xf32>,
    %23 = vector.extract_strided_slice %1 {offsets = [0, 255], sizes = [8, 1], strides = [1, 1]} : vector<8x256xf32> to vector<8x1xf32>
    %24 = vector.extract_strided_slice %1 {offsets = [0, 0], sizes = [8, 255], strides = [1, 1]} : vector<8x256xf32> to vector<8x255xf32>
    %25 = tpu.concatenate %23, %24 in 1 : vector<8x1xf32>, vector<8x255xf32> -> vector<8x256xf32>
    %c3 = arith.constant 3 : index
    %c0_13 = arith.constant 0 : index
    %c0_14 = arith.constant 0 : index
    %26 = vector.load %arg2[%c3, %c0_13, %c0_14] : memref<9x8x256xf32, #tpu.memory_space<vmem>>, vector<1x8x256xf32>
    %27 = vector.shape_cast %26 : vector<1x8x256xf32> to vector<8x256xf32>
    %28 = arith.mulf %25, %27 : vector<8x256xf32>
    %c24 = arith.constant 24 : index
    %c0_15 = arith.constant 0 : index
    %29 = vector.load %arg8[%c24, %c0_15] : memref<72x256xf32, #tpu.memory_space<vmem>>, vector<8x256xf32>
    tpu.vector_store %arg8[%c24, %c0_15], %28 {strides = array<i32>} : memref<72x256xf32, #tpu.memory_space<vmem>>, vector<8x256xf32>,
    %c32 = arith.constant 32 : index
    %c0_16 = arith.constant 0 : index
    %30 = vector.load %arg8[%c32, %c0_16] : memref<72x256xf32, #tpu.memory_space<vmem>>, vector<8x256xf32>
    tpu.vector_store %arg8[%c32, %c0_16], %1 {strides = array<i32>} : memref<72x256xf32, #tpu.memory_space<vmem>>, vector<8x256xf32>,
    %31 = vector.extract_strided_slice %1 {offsets = [0, 1], sizes = [8, 255], strides = [1, 1]} : vector<8x256xf32> to vector<8x255xf32>
    %32 = vector.extract_strided_slice %1 {offsets = [0, 0], sizes = [8, 1], strides = [1, 1]} : vector<8x256xf32> to vector<8x1xf32>
    %33 = tpu.concatenate %31, %32 in 1 : vector<8x255xf32>, vector<8x1xf32> -> vector<8x256xf32>
    %c5 = arith.constant 5 : index
    %c0_17 = arith.constant 0 : index
    %c0_18 = arith.constant 0 : index
    %34 = vector.load %arg2[%c5, %c0_17, %c0_18] : memref<9x8x256xf32, #tpu.memory_space<vmem>>, vector<1x8x256xf32>
    %35 = vector.shape_cast %34 : vector<1x8x256xf32> to vector<8x256xf32>
    %36 = arith.mulf %33, %35 : vector<8x256xf32>
    %c40 = arith.constant 40 : index
    %c0_19 = arith.constant 0 : index
    %37 = vector.load %arg8[%c40, %c0_19] : memref<72x256xf32, #tpu.memory_space<vmem>>, vector<8x256xf32>
    tpu.vector_store %arg8[%c40, %c0_19], %36 {strides = array<i32>} : memref<72x256xf32, #tpu.memory_space<vmem>>, vector<8x256xf32>,
    %38 = vector.extract_strided_slice %1 {offsets = [0, 15], sizes = [8, 241], strides = [1, 1]} : vector<8x256xf32> to vector<8x241xf32>
    %39 = vector.extract_strided_slice %1 {offsets = [0, 0], sizes = [8, 15], strides = [1, 1]} : vector<8x256xf32> to vector<8x15xf32>
    %40 = tpu.concatenate %38, %39 in 1 : vector<8x241xf32>, vector<8x15xf32> -> vector<8x256xf32>
    %c6 = arith.constant 6 : index
    %c0_20 = arith.constant 0 : index
    %c0_21 = arith.constant 0 : index
    %41 = vector.load %arg2[%c6, %c0_20, %c0_21] : memref<9x8x256xf32, #tpu.memory_space<vmem>>, vector<1x8x256xf32>
    %42 = vector.shape_cast %41 : vector<1x8x256xf32> to vector<8x256xf32>
    %43 = arith.mulf %40, %42 : vector<8x256xf32>
    %c48 = arith.constant 48 : index
    %c0_22 = arith.constant 0 : index
    %44 = vector.load %arg8[%c48, %c0_22] : memref<72x256xf32, #tpu.memory_space<vmem>>, vector<8x256xf32>
    tpu.vector_store %arg8[%c48, %c0_22], %43 {strides = array<i32>} : memref<72x256xf32, #tpu.memory_space<vmem>>, vector<8x256xf32>,
    %45 = vector.extract_strided_slice %1 {offsets = [0, 16], sizes = [8, 240], strides = [1, 1]} : vector<8x256xf32> to vector<8x240xf32>
    %46 = vector.extract_strided_slice %1 {offsets = [0, 0], sizes = [8, 16], strides = [1, 1]} : vector<8x256xf32> to vector<8x16xf32>
    %47 = tpu.concatenate %45, %46 in 1 : vector<8x240xf32>, vector<8x16xf32> -> vector<8x256xf32>
    %c7 = arith.constant 7 : index
    %c0_23 = arith.constant 0 : index
    %c0_24 = arith.constant 0 : index
    %48 = vector.load %arg2[%c7, %c0_23, %c0_24] : memref<9x8x256xf32, #tpu.memory_space<vmem>>, vector<1x8x256xf32>
    %49 = vector.shape_cast %48 : vector<1x8x256xf32> to vector<8x256xf32>
    %50 = arith.mulf %47, %49 : vector<8x256xf32>
    %c56 = arith.constant 56 : index
    %c0_25 = arith.constant 0 : index
    %51 = vector.load %arg8[%c56, %c0_25] : memref<72x256xf32, #tpu.memory_space<vmem>>, vector<8x256xf32>
    tpu.vector_store %arg8[%c56, %c0_25], %50 {strides = array<i32>} : memref<72x256xf32, #tpu.memory_space<vmem>>, vector<8x256xf32>,
    %52 = vector.extract_strided_slice %1 {offsets = [0, 17], sizes = [8, 239], strides = [1, 1]} : vector<8x256xf32> to vector<8x239xf32>
    %53 = vector.extract_strided_slice %1 {offsets = [0, 0], sizes = [8, 17], strides = [1, 1]} : vector<8x256xf32> to vector<8x17xf32>
    %54 = tpu.concatenate %52, %53 in 1 : vector<8x239xf32>, vector<8x17xf32> -> vector<8x256xf32>
    %c8_26 = arith.constant 8 : index
    %c0_27 = arith.constant 0 : index
    %c0_28 = arith.constant 0 : index
    %55 = vector.load %arg2[%c8_26, %c0_27, %c0_28] : memref<9x8x256xf32, #tpu.memory_space<vmem>>, vector<1x8x256xf32>
    %56 = vector.shape_cast %55 : vector<1x8x256xf32> to vector<8x256xf32>
    %57 = arith.mulf %54, %56 : vector<8x256xf32>
    %c64 = arith.constant 64 : index
    %c0_29 = arith.constant 0 : index
    %58 = vector.load %arg8[%c64, %c0_29] : memref<72x256xf32, #tpu.memory_space<vmem>>, vector<8x256xf32>
    tpu.vector_store %arg8[%c64, %c0_29], %57 {strides = array<i32>} : memref<72x256xf32, #tpu.memory_space<vmem>>, vector<8x256xf32>,
    %c0_30 = arith.constant 0 : index
    %c0_31 = arith.constant 0 : index
    %59 = vector.load %arg3[%c0_30, %c0_31] : memref<8x72xbf16, #tpu.memory_space<vmem>>, vector<8x72xbf16>
    %c0_32 = arith.constant 0 : index
    %c0_33 = arith.constant 0 : index
    %60 = vector.load %arg8[%c0_32, %c0_33] : memref<72x256xf32, #tpu.memory_space<vmem>>, vector<72x256xf32>
    %61 = arith.truncf %60 : vector<72x256xf32> to vector<72x256xbf16>
    %cst = arith.constant dense<0.000000e+00> : vector<8x256xf32>
    %62 = tpu.matmul %59, %61, %cst {dimension_numbers = #tpu.dot_dimension_numbers<[1], [0], [0], [1], [0, 0, 1, 1], [], []>} : vector<8x72xbf16>, vector<72x256xbf16>, vector<8x256xf32> -> vector<8x256xf32>
    %c0_34 = arith.constant 0 : index
    %c0_35 = arith.constant 0 : index
    %63 = vector.load %arg4[%c0_34, %c0_35] : memref<8x1xf32, #tpu.memory_space<vmem>>, vector<8x1xf32>
    %64 = vector.broadcast %63 : vector<8x1xf32> to vector<8x256xf32>
    %65 = arith.addf %62, %64 : vector<8x256xf32>
    %cst_36 = arith.constant 0.000000e+00 : f32
    %66 = vector.broadcast %cst_36 : f32 to vector<8x256xf32>
    %67 = arith.maximumf %65, %66 : vector<8x256xf32>
    %68 = vector.extract_strided_slice %67 {offsets = [0, 239], sizes = [8, 17], strides = [1, 1]} : vector<8x256xf32> to vector<8x17xf32>
    %69 = vector.extract_strided_slice %67 {offsets = [0, 0], sizes = [8, 239], strides = [1, 1]} : vector<8x256xf32> to vector<8x239xf32>
    %70 = tpu.concatenate %68, %69 in 1 : vector<8x17xf32>, vector<8x239xf32> -> vector<8x256xf32>
    %c0_37 = arith.constant 0 : index
    %c0_38 = arith.constant 0 : index
    %c0_39 = arith.constant 0 : index
    %71 = vector.load %arg2[%c0_37, %c0_38, %c0_39] : memref<9x8x256xf32, #tpu.memory_space<vmem>>, vector<1x8x256xf32>
    %72 = vector.shape_cast %71 : vector<1x8x256xf32> to vector<8x256xf32>
    %73 = arith.mulf %70, %72 : vector<8x256xf32>
    %c0_40 = arith.constant 0 : index
    %c0_41 = arith.constant 0 : index
    %74 = vector.load %arg9[%c0_40, %c0_41] : memref<72x256xf32, #tpu.memory_space<vmem>>, vector<8x256xf32>
    tpu.vector_store %arg9[%c0_40, %c0_41], %73 {strides = array<i32>} : memref<72x256xf32, #tpu.memory_space<vmem>>, vector<8x256xf32>,
    %75 = vector.extract_strided_slice %67 {offsets = [0, 240], sizes = [8, 16], strides = [1, 1]} : vector<8x256xf32> to vector<8x16xf32>
    %76 = vector.extract_strided_slice %67 {offsets = [0, 0], sizes = [8, 240], strides = [1, 1]} : vector<8x256xf32> to vector<8x240xf32>
    %77 = tpu.concatenate %75, %76 in 1 : vector<8x16xf32>, vector<8x240xf32> -> vector<8x256xf32>
    %c1_42 = arith.constant 1 : index
    %c0_43 = arith.constant 0 : index
    %c0_44 = arith.constant 0 : index
    %78 = vector.load %arg2[%c1_42, %c0_43, %c0_44] : memref<9x8x256xf32, #tpu.memory_space<vmem>>, vector<1x8x256xf32>
    %79 = vector.shape_cast %78 : vector<1x8x256xf32> to vector<8x256xf32>
    %80 = arith.mulf %77, %79 : vector<8x256xf32>
    %c8_45 = arith.constant 8 : index
    %c0_46 = arith.constant 0 : index
    %81 = vector.load %arg9[%c8_45, %c0_46] : memref<72x256xf32, #tpu.memory_space<vmem>>, vector<8x256xf32>
    tpu.vector_store %arg9[%c8_45, %c0_46], %80 {strides = array<i32>} : memref<72x256xf32, #tpu.memory_space<vmem>>, vector<8x256xf32>,
    %82 = vector.extract_strided_slice %67 {offsets = [0, 241], sizes = [8, 15], strides = [1, 1]} : vector<8x256xf32> to vector<8x15xf32>
    %83 = vector.extract_strided_slice %67 {offsets = [0, 0], sizes = [8, 241], strides = [1, 1]} : vector<8x256xf32> to vector<8x241xf32>
    %84 = tpu.concatenate %82, %83 in 1 : vector<8x15xf32>, vector<8x241xf32> -> vector<8x256xf32>
    %c2_47 = arith.constant 2 : index
    %c0_48 = arith.constant 0 : index
    %c0_49 = arith.constant 0 : index
    %85 = vector.load %arg2[%c2_47, %c0_48, %c0_49] : memref<9x8x256xf32, #tpu.memory_space<vmem>>, vector<1x8x256xf32>
    %86 = vector.shape_cast %85 : vector<1x8x256xf32> to vector<8x256xf32>
    %87 = arith.mulf %84, %86 : vector<8x256xf32>
    %c16_50 = arith.constant 16 : index
    %c0_51 = arith.constant 0 : index
    %88 = vector.load %arg9[%c16_50, %c0_51] : memref<72x256xf32, #tpu.memory_space<vmem>>, vector<8x256xf32>
    tpu.vector_store %arg9[%c16_50, %c0_51], %87 {strides = array<i32>} : memref<72x256xf32, #tpu.memory_space<vmem>>, vector<8x256xf32>,
    %89 = vector.extract_strided_slice %67 {offsets = [0, 255], sizes = [8, 1], strides = [1, 1]} : vector<8x256xf32> to vector<8x1xf32>
    %90 = vector.extract_strided_slice %67 {offsets = [0, 0], sizes = [8, 255], strides = [1, 1]} : vector<8x256xf32> to vector<8x255xf32>
    %91 = tpu.concatenate %89, %90 in 1 : vector<8x1xf32>, vector<8x255xf32> -> vector<8x256xf32>
    %c3_52 = arith.constant 3 : index
    %c0_53 = arith.constant 0 : index
    %c0_54 = arith.constant 0 : index
    %92 = vector.load %arg2[%c3_52, %c0_53, %c0_54] : memref<9x8x256xf32, #tpu.memory_space<vmem>>, vector<1x8x256xf32>
    %93 = vector.shape_cast %92 : vector<1x8x256xf32> to vector<8x256xf32>
    %94 = arith.mulf %91, %93 : vector<8x256xf32>
    %c24_55 = arith.constant 24 : index
    %c0_56 = arith.constant 0 : index
    %95 = vector.load %arg9[%c24_55, %c0_56] : memref<72x256xf32, #tpu.memory_space<vmem>>, vector<8x256xf32>
    tpu.vector_store %arg9[%c24_55, %c0_56], %94 {strides = array<i32>} : memref<72x256xf32, #tpu.memory_space<vmem>>, vector<8x256xf32>,
    %c32_57 = arith.constant 32 : index
    %c0_58 = arith.constant 0 : index
    %96 = vector.load %arg9[%c32_57, %c0_58] : memref<72x256xf32, #tpu.memory_space<vmem>>, vector<8x256xf32>
    tpu.vector_store %arg9[%c32_57, %c0_58], %67 {strides = array<i32>} : memref<72x256xf32, #tpu.memory_space<vmem>>, vector<8x256xf32>,
    %97 = vector.extract_strided_slice %67 {offsets = [0, 1], sizes = [8, 255], strides = [1, 1]} : vector<8x256xf32> to vector<8x255xf32>
    %98 = vector.extract_strided_slice %67 {offsets = [0, 0], sizes = [8, 1], strides = [1, 1]} : vector<8x256xf32> to vector<8x1xf32>
    %99 = tpu.concatenate %97, %98 in 1 : vector<8x255xf32>, vector<8x1xf32> -> vector<8x256xf32>
    %c5_59 = arith.constant 5 : index
    %c0_60 = arith.constant 0 : index
    %c0_61 = arith.constant 0 : index
    %100 = vector.load %arg2[%c5_59, %c0_60, %c0_61] : memref<9x8x256xf32, #tpu.memory_space<vmem>>, vector<1x8x256xf32>
    %101 = vector.shape_cast %100 : vector<1x8x256xf32> to vector<8x256xf32>
    %102 = arith.mulf %99, %101 : vector<8x256xf32>
    %c40_62 = arith.constant 40 : index
    %c0_63 = arith.constant 0 : index
    %103 = vector.load %arg9[%c40_62, %c0_63] : memref<72x256xf32, #tpu.memory_space<vmem>>, vector<8x256xf32>
    tpu.vector_store %arg9[%c40_62, %c0_63], %102 {strides = array<i32>} : memref<72x256xf32, #tpu.memory_space<vmem>>, vector<8x256xf32>,
    %104 = vector.extract_strided_slice %67 {offsets = [0, 15], sizes = [8, 241], strides = [1, 1]} : vector<8x256xf32> to vector<8x241xf32>
    %105 = vector.extract_strided_slice %67 {offsets = [0, 0], sizes = [8, 15], strides = [1, 1]} : vector<8x256xf32> to vector<8x15xf32>
    %106 = tpu.concatenate %104, %105 in 1 : vector<8x241xf32>, vector<8x15xf32> -> vector<8x256xf32>
    %c6_64 = arith.constant 6 : index
    %c0_65 = arith.constant 0 : index
    %c0_66 = arith.constant 0 : index
    %107 = vector.load %arg2[%c6_64, %c0_65, %c0_66] : memref<9x8x256xf32, #tpu.memory_space<vmem>>, vector<1x8x256xf32>
    %108 = vector.shape_cast %107 : vector<1x8x256xf32> to vector<8x256xf32>
    %109 = arith.mulf %106, %108 : vector<8x256xf32>
    %c48_67 = arith.constant 48 : index
    %c0_68 = arith.constant 0 : index
    %110 = vector.load %arg9[%c48_67, %c0_68] : memref<72x256xf32, #tpu.memory_space<vmem>>, vector<8x256xf32>
    tpu.vector_store %arg9[%c48_67, %c0_68], %109 {strides = array<i32>} : memref<72x256xf32, #tpu.memory_space<vmem>>, vector<8x256xf32>,
    %111 = vector.extract_strided_slice %67 {offsets = [0, 16], sizes = [8, 240], strides = [1, 1]} : vector<8x256xf32> to vector<8x240xf32>
    %112 = vector.extract_strided_slice %67 {offsets = [0, 0], sizes = [8, 16], strides = [1, 1]} : vector<8x256xf32> to vector<8x16xf32>
    %113 = tpu.concatenate %111, %112 in 1 : vector<8x240xf32>, vector<8x16xf32> -> vector<8x256xf32>
    %c7_69 = arith.constant 7 : index
    %c0_70 = arith.constant 0 : index
    %c0_71 = arith.constant 0 : index
    %114 = vector.load %arg2[%c7_69, %c0_70, %c0_71] : memref<9x8x256xf32, #tpu.memory_space<vmem>>, vector<1x8x256xf32>
    %115 = vector.shape_cast %114 : vector<1x8x256xf32> to vector<8x256xf32>
    %116 = arith.mulf %113, %115 : vector<8x256xf32>
    %c56_72 = arith.constant 56 : index
    %c0_73 = arith.constant 0 : index
    %117 = vector.load %arg9[%c56_72, %c0_73] : memref<72x256xf32, #tpu.memory_space<vmem>>, vector<8x256xf32>
    tpu.vector_store %arg9[%c56_72, %c0_73], %116 {strides = array<i32>} : memref<72x256xf32, #tpu.memory_space<vmem>>, vector<8x256xf32>,
    %118 = vector.extract_strided_slice %67 {offsets = [0, 17], sizes = [8, 239], strides = [1, 1]} : vector<8x256xf32> to vector<8x239xf32>
    %119 = vector.extract_strided_slice %67 {offsets = [0, 0], sizes = [8, 17], strides = [1, 1]} : vector<8x256xf32> to vector<8x17xf32>
    %120 = tpu.concatenate %118, %119 in 1 : vector<8x239xf32>, vector<8x17xf32> -> vector<8x256xf32>
    %c8_74 = arith.constant 8 : index
    %c0_75 = arith.constant 0 : index
    %c0_76 = arith.constant 0 : index
    %121 = vector.load %arg2[%c8_74, %c0_75, %c0_76] : memref<9x8x256xf32, #tpu.memory_space<vmem>>, vector<1x8x256xf32>
    %122 = vector.shape_cast %121 : vector<1x8x256xf32> to vector<8x256xf32>
    %123 = arith.mulf %120, %122 : vector<8x256xf32>
    %c64_77 = arith.constant 64 : index
    %c0_78 = arith.constant 0 : index
    %124 = vector.load %arg9[%c64_77, %c0_78] : memref<72x256xf32, #tpu.memory_space<vmem>>, vector<8x256xf32>
    tpu.vector_store %arg9[%c64_77, %c0_78], %123 {strides = array<i32>} : memref<72x256xf32, #tpu.memory_space<vmem>>, vector<8x256xf32>,
    %c0_79 = arith.constant 0 : index
    %c0_80 = arith.constant 0 : index
    %125 = vector.load %arg5[%c0_79, %c0_80] : memref<8x72xbf16, #tpu.memory_space<vmem>>, vector<8x72xbf16>
    %c0_81 = arith.constant 0 : index
    %c0_82 = arith.constant 0 : index
    %126 = vector.load %arg9[%c0_81, %c0_82] : memref<72x256xf32, #tpu.memory_space<vmem>>, vector<72x256xf32>
    %127 = arith.truncf %126 : vector<72x256xf32> to vector<72x256xbf16>
    %cst_83 = arith.constant dense<0.000000e+00> : vector<8x256xf32>
    %128 = tpu.matmul %125, %127, %cst_83 {dimension_numbers = #tpu.dot_dimension_numbers<[1], [0], [0], [1], [0, 0, 1, 1], [], []>} : vector<8x72xbf16>, vector<72x256xbf16>, vector<8x256xf32> -> vector<8x256xf32>
    %c0_84 = arith.constant 0 : index
    %c0_85 = arith.constant 0 : index
    %129 = vector.load %arg6[%c0_84, %c0_85] : memref<8x1xf32, #tpu.memory_space<vmem>>, vector<8x1xf32>
    %130 = vector.broadcast %129 : vector<8x1xf32> to vector<8x256xf32>
    %131 = arith.addf %128, %130 : vector<8x256xf32>
    %cst_86 = arith.constant 0.000000e+00 : f32
    %132 = vector.broadcast %cst_86 : f32 to vector<8x256xf32>
    %133 = arith.maximumf %131, %132 : vector<8x256xf32>
    %c0_87 = arith.constant 0 : index
    %c0_88 = arith.constant 0 : index
    %c0_89 = arith.constant 0 : index
    %134 = vector.load %arg7[%c0_87, %c0_88, %c0_89] : memref<1x8x256xf32, #tpu.memory_space<vmem>>, vector<1x8x256xf32>
    %135 = vector.shape_cast %134 : vector<1x8x256xf32> to vector<8x256xf32>
    %136 = vector.shape_cast %133 : vector<8x256xf32> to vector<1x8x256xf32>
    tpu.vector_store %arg7[%c0_87, %c0_88, %c0_89], %136 {strides = array<i32>} : memref<1x8x256xf32, #tpu.memory_space<vmem>>, vector<1x8x256xf32>,
    return
  }
  func.func @transform_0(%arg0: i32) -> (i32, i32, i32) {
    %c0_i32 = arith.constant 0 : i32
    %c0_i32_0 = arith.constant 0 : i32
    %c0_i32_1 = arith.constant 0 : i32
    return %arg0, %c0_i32, %c0_i32_0 : i32, i32, i32
  }
  func.func @transform_1(%arg0: i32) -> (i32, i32, i32) {
    %c0_i32 = arith.constant 0 : i32
    %c0_i32_0 = arith.constant 0 : i32
    %c0_i32_1 = arith.constant 0 : i32
    %c0_i32_2 = arith.constant 0 : i32
    return %c0_i32, %c0_i32_0, %c0_i32_1 : i32, i32, i32
  }
  func.func @transform_2(%arg0: i32) -> (i32, i32) {
    %c0_i32 = arith.constant 0 : i32
    %c0_i32_0 = arith.constant 0 : i32
    %c0_i32_1 = arith.constant 0 : i32
    return %c0_i32, %c0_i32_0 : i32, i32
  }
  func.func @transform_3(%arg0: i32) -> (i32, i32) {
    %c0_i32 = arith.constant 0 : i32
    %c0_i32_0 = arith.constant 0 : i32
    %c0_i32_1 = arith.constant 0 : i32
    return %c0_i32, %c0_i32_0 : i32, i32
  }
  func.func @transform_4(%arg0: i32) -> (i32, i32) {
    %c0_i32 = arith.constant 0 : i32
    %c0_i32_0 = arith.constant 0 : i32
    %c0_i32_1 = arith.constant 0 : i32
    return %c0_i32, %c0_i32_0 : i32, i32
  }
  func.func @transform_5(%arg0: i32) -> (i32, i32) {
    %c0_i32 = arith.constant 0 : i32
    %c0_i32_0 = arith.constant 0 : i32
    %c0_i32_1 = arith.constant 0 : i32
    return %c0_i32, %c0_i32_0 : i32, i32
  }
  func.func @transform_6(%arg0: i32) -> (i32, i32, i32) {
    %c0_i32 = arith.constant 0 : i32
    %c0_i32_0 = arith.constant 0 : i32
    %c0_i32_1 = arith.constant 0 : i32
    return %arg0, %c0_i32, %c0_i32_0 : i32, i32, i32
  }
}

</mosaic_0001>

<bundles_post_ra>
// kernel: conv_block_forward.1
= control target key start
LH: loop header
LB: loop body
LE: loop exit
PB: predicated region body
PF: predicated region fallthrough
CT: control target
= control target key end

     0   :  { %s866_s21 = smov 0   ;;  %s1117_s0 = inlined_call_operand.vmem [shape: f32[2,8,256], index: 0, kind: input, shape index: {}]   ;;  %s1118_s1 = inlined_call_operand.vmem [shape: f32[9,8,256], index: 1, kind: input, shape index: {}]   ;;  %s1119_s2 = inlined_call_operand.vmem [shape: bf16[8,72], index: 2, kind: input, shape index: {}]   ;;  %s1120_s3 = inlined_call_operand.vmem [shape: f32[8,1], index: 3, kind: input, shape index: {}]   ;;  %s1121_s4 = inlined_call_operand.vmem [shape: bf16[8,72], index: 4, kind: input, shape index: {}]   ;;  %s1122_s5 = inlined_call_operand.vmem [shape: f32[8,1], index: 5, kind: input, shape index: {}]   ;;  %s1123_s6 = inlined_call_operand.vmem [shape: f32[2,8,256], index: 6, kind: output, shape index: {}]  }
   0x1 LB: > { %s751_s22 = sadd.s32 4294967295, %s820_s21   ;;  %p755_p0 = scmp.ge.s32.totalorder %s820_s21, 1  ;;  %s820_s21 = sphi %s866_s21, %s16_s21  }
   0x2   : > { %p212_p1 = scmp.lt.s32.totalorder %s820_s21, 3 }
   0x4   : > { %p213_p2 = pnand %p755_p0, %p212_p1 }
   0x5   : > { %p242_p3 = scmp.lt.s32.totalorder (!%p213_p2), %s751_s22, 1  ;;  %s822_s27 = smov (!%p213_p2), 16   ;;  %v828_v2 = vmov (!%p213_p2), 0   ;;  %v423_v3 = vld [vmem:[%s1120_s3] sm:$0xff] (!%p213_p2)  ;;  %vm278_vm0 = vcmask (!%p213_p2), 130048   ;;  %v924_v6 = vld [vmem:[%s1118_s1 + $0x10] sm:$0xff] (!%p213_p2) }
   0x6   : > { %216 = sbr.rel (%p213_p2) target bundleno = 759 (0x2f7), region = 44  ;;  %s823_s28 = smov (!%p213_p2), 17   ;;  %472 = vmatprep.mubr.bf16.mxu0 (!%p213_p2), %v828_v2  ;;  %813 = vset.pattern.permute.xlu0 (!%p213_p2), %v828_v2  ;;  %vm262_vm1 = vcmask (!%p213_p2), 138240   ;;  %v929_v7 = vld [vmem:[%s1118_s1] sm:$0xff] (!%p213_p2)  ;;  %v934_v8 = vld [vmem:[%s1118_s1 + $0x8] sm:$0xff] (!%p213_p2)  ;;  %v939_v9 = vld [vmem:[%s1118_s1 + $0x18] sm:$0xff] (!%p213_p2) }
   0x7   : > { %s824_s29 = smov (!%p213_p2), 15   ;;  %s825_s30 = smov (!%p213_p2), 1   ;;  %683 = vmatprep.mubr.bf16.mxu1 (!%p213_p2), %v828_v2  ;;  %vm295_vm2 = vcmask (!%p213_p2), 121856   ;;  %v952_v24 = vld [vmem:[%s1118_s1 + $0x20] sm:$0xff] (!%p213_p2)  ;;  %vm312_vm3 = vcmask (!%p213_p2), 7168   ;;  %v957_v25 = vld [vmem:[%s1118_s1 + $0x28] sm:$0xff] (!%p213_p2) }
   0x8   : > { %s826_s7 = smov (!%p213_p2), 127   ;;  %s827_s8 = smov (!%p213_p2), 113   ;;  %v964_v28 = vld [vmem:[%s1118_s1 + $0x30] sm:$0xff] (!%p213_p2)  ;;  %v969_v29 = vld [vmem:[%s1118_s1 + $0x38] sm:$0xff] (!%p213_p2)  ;;  %vm330_vm4 = vcmask (!%p213_p2), 1039360   ;;  %vm347_vm5 = vcmask (!%p213_p2), 924672  }
   0x9   : > { %s829_s9 = smov (!%p213_p2), 112   ;;  %s830_s10 = smov (!%p213_p2), 111   ;;  %v980_v38 = vld [vmem:[%s1118_s1 + $0x50] sm:$0xff] (!%p213_p2)  ;;  %v985_v39 = vld [vmem:[%s1118_s1 + $0x58] sm:$0xff] (!%p213_p2)  ;;  %v996_v52 = vld [vmem:[%s1118_s1 + $0x60] sm:$0xff] (!%p213_p2)  ;;  %vm364_vm6 = vcmask (!%p213_p2), 916480  }
   0xa   : > { %v1001_v53 = vld [vmem:[%s1118_s1 + $0x68] sm:$0xff] (!%p213_p2)  ;;  %v1008_v56 = vld [vmem:[%s1118_s1 + $0x70] sm:$0xff] (!%p213_p2)  ;;  %v1013_v57 = vld [vmem:[%s1118_s1 + $0x78] sm:$0xff] (!%p213_p2)  ;;  %vm381_vm7 = vcmask (!%p213_p2), 908288   ;;  %vm433_vm8 = vcmask (!%p213_p2), 1043456   ;;  %vm429_vm9 = vcmask (!%p213_p2), 588800  }
   0xb   : > { %v1024_v2 = vld [vmem:[%s1118_s1 + $0x80] sm:$0xff] (!%p213_p2) }
   0xd   : > { %s1125_s22 = smov (!%p242_p3, %s751_s22), 1 }
   0xe   : > { %s794_s23 = sshll.u32 %s1125_s22, 4 }
   0xf   : > { %s246_s26 = scalar_lea.vmem %s1117_s0, %s794_s23 }
  0x10   : > { %v882_v0 = vld [vmem:[%s246_s26 + $0x8] sm:$0xff]  ;;  %v888_v1 = vld [vmem:[%s246_s26] sm:$0xff] }
  0x11   : > { %273 = vrot.lane.b32.xlu1 %v882_v0, %s822_s27  ;;  %256 = vrot.lane.b32.xlu0 %v882_v0, %s823_s28 }
  0x15   : > { %276 = vrot.lane.b32.xlu1 %v888_v1, %s822_s27  ;;  %260 = vrot.lane.b32.xlu0 %v888_v1, %s823_s28 }
  0x19   : > { %293 = vrot.lane.b32.xlu1 %v888_v1, %s824_s29  ;;  %290 = vrot.lane.b32.xlu0 %v882_v0, %s824_s29 }
  0x1d   : > { %310 = vrot.lane.b32.xlu1 %v888_v1, %s825_s30  ;;  %307 = vrot.lane.b32.xlu0 %v882_v0, %s825_s30 }
  0x21   : > { %328 = vrot.lane.b32.xlu1 %v882_v0, %s826_s7  ;;  %326 = vrot.lane.b32.xlu0 %v888_v1, %s826_s7 }
  0x25   : > { %345 = vrot.lane.b32.xlu1 %v882_v0, %s827_s8  ;;  %343 = vrot.lane.b32.xlu0 %v888_v1, %s827_s8 }
  0x29   : > { %362 = vrot.lane.b32.xlu1 %v882_v0, %s829_s9  ;;  %360 = vrot.lane.b32.xlu0 %v888_v1, %s829_s9 }
  0x2d   : > { %379 = vrot.lane.b32.xlu1 %v882_v0, %s830_s10  ;;  %377 = vrot.lane.b32.xlu0 %v888_v1, %s830_s10 }
  0x31   : > { %426 = vperm.xlu0 %813, %v423_v3   ;;  %v1029_v3 = vld [vmem:[%s1118_s1 + $0x88] sm:$0xff] }
  0x83   : > { %v274_v4 = vpop.permute.xlu1 %273  ;;  %v257_v5 = vpop.permute.xlu0 %256 }
  0x87   : > { %v277_v10 = vpop.permute.xlu1 %276  ;;  %v261_v11 = vpop.permute.xlu0 %260 }
  0x88   : > { %v279_v12 = vsel %vm278_vm0, %v277_v10, %v274_v4  ;;  %v282_v13 = vsel %vm278_vm0, %v274_v4, %v277_v10  ;;  %v263_v14 = vsel %vm262_vm1, %v261_v11, %v257_v5  ;;  %v266_v15 = vsel %vm262_vm1, %v257_v5, %v261_v11 }
  0x89   : > { %v286_v16 = vmul.f32 %v924_v6, %v282_v13  ;;  %v269_v17 = vmul.f32 %v929_v7, %v266_v15  ;;  %v270_v18 = vmul.f32 %v934_v8, %v263_v14  ;;  %v287_v19 = vmul.f32 %v939_v9, %v279_v12 }
  0x8b   : > { %v294_v20 = vpop.permute.xlu1 %293  ;;  %v291_v21 = vpop.permute.xlu0 %290  ;;  %v414_v22 = vpack.c.bf16 %v287_v19, %v270_v18  ;;  %v413_v23 = vpack.c.bf16 %v286_v16, %v269_v17  ;;  %v394_v19 = vld [vmem:[%s1119_s2] sm:$0xf] }
  0x8c   : > { %v296_v26 = vsel %vm295_vm2, %v294_v20, %v291_v21  ;;  %v299_v27 = vsel %vm295_vm2, %v291_v21, %v294_v20 }
  0x8d   : > { %440 = vmatprep.subr.bf16.mxu0 %v414_v22  ;;  %v303_v34 = vmul.f32 %v952_v24, %v299_v27  ;;  %v304_v35 = vmul.f32 %v957_v25, %v296_v26 }
  0x8e   : > { %441 = vmatpush1.bf16.msra.mxu0 %v413_v23 }
  0x8f   : > { %v311_v30 = vpop.permute.xlu1 %310  ;;  %v308_v31 = vpop.permute.xlu0 %307 }
  0x90   : > { %v313_v32 = vsel %vm312_vm3, %v311_v30, %v308_v31  ;;  %v316_v33 = vsel %vm312_vm3, %v308_v31, %v311_v30 }
  0x91   : > { %v320_v36 = vmul.f32 %v964_v28, %v316_v33  ;;  %v321_v37 = vmul.f32 %v969_v29, %v313_v32  ;;  %v636_v33 = vld [vmem:[%s1122_s5] sm:$0xff] }
  0x93   : > { %v329_v40 = vpop.permute.xlu1 %328  ;;  %v327_v41 = vpop.permute.xlu0 %326  ;;  %v416_v42 = vpack.c.bf16 %v321_v37, %v304_v35  ;;  %v415_v43 = vpack.c.bf16 %v320_v36, %v303_v34 }
  0x94   : > { %v331_v44 = vsel %vm330_vm4, %v327_v41, %v329_v40  ;;  %v335_v45 = vsel %vm330_vm4, %v329_v40, %v327_v41 }
  0x95   : > { %v339_v46 = vmul.f32 %v980_v38, %v331_v44  ;;  %v340_v47 = vmul.f32 %v985_v39, %v335_v45  ;;  %442 = vmatprep.subr.bf16.mxu0 %v416_v42 }
  0x96   : > { %443 = vmatpush1.bf16.msra.mxu0 %v415_v43 }
  0x97   : > { %v346_v48 = vpop.permute.xlu1 %345  ;;  %v344_v49 = vpop.permute.xlu0 %343  ;;  %v418_v50 = vpack.c.bf16 %v340_v47, %v882_v0  ;;  %v417_v51 = vpack.c.bf16 %v339_v46, %v888_v1 }
  0x98   : > { %v348_v54 = vsel %vm347_vm5, %v344_v49, %v346_v48  ;;  %v352_v55 = vsel %vm347_vm5, %v346_v48, %v344_v49 }
  0x99   : > { %444 = vmatprep.subr.bf16.mxu0 %v418_v50  ;;  %v356_v62 = vmul.f32 %v996_v52, %v348_v54  ;;  %v357_v63 = vmul.f32 %v1001_v53, %v352_v55 }
  0x9a   : > { %445 = vmatpush1.bf16.msra.mxu0 %v417_v51 }
  0x9b   : > { %v363_v58 = vpop.permute.xlu1 %362  ;;  %v361_v59 = vpop.permute.xlu0 %360 }
  0x9c   : > { %v365_v60 = vsel %vm364_vm6, %v361_v59, %v363_v58  ;;  %v369_v61 = vsel %vm364_vm6, %v363_v58, %v361_v59 }
  0x9d   : > { %v373_v0 = vmul.f32 %v1008_v56, %v365_v60  ;;  %v374_v1 = vmul.f32 %v1013_v57, %v369_v61 }
  0x9f   : > { %v380_v4 = vpop.permute.xlu1 %379  ;;  %v378_v5 = vpop.permute.xlu0 %377  ;;  %v420_v10 = vpack.c.bf16 %v374_v1, %v357_v63  ;;  %v419_v11 = vpack.c.bf16 %v373_v0, %v356_v62 }
  0xa0   : > { %v382_v12 = vsel %vm381_vm7, %v378_v5, %v380_v4  ;;  %v386_v13 = vsel %vm381_vm7, %v380_v4, %v378_v5 }
  0xa1   : > { %v390_v14 = vmul.f32 %v1024_v2, %v382_v12  ;;  %v391_v15 = vmul.f32 %v1029_v3, %v386_v13  ;;  %446 = vmatprep.subr.bf16.mxu0 %v420_v10 }
  0xa2   : > { %447 = vmatpush1.bf16.msra.mxu0 %v419_v11 }
  0xa3   : > { %v421_v16 = vpack.c.bf16 %v390_v14, %v390_v14  ;;  %v422_v17 = vpack.c.bf16 %v391_v15, %v391_v15 }
  0xa5   : > { %774 = vmatprep.subr.msk.bf16.mxu0 %vm433_vm8, %v422_v17  ;;  %v435_v18 = vsel %vm433_vm8, %v421_v16, 0 }
  0xa6   : > { %449 = vmatpush1.bf16.msra.mxu0 %v435_v18 }
  0xa9   : > { %775 = vmatmul.mubr.msk.bf16.vlgmr.msra.gmra.mrb[0].mxu0 %vm429_vm9, %v394_v19 }
  0xb0   : > { %v427_v20 = vpop.permute.xlu0 %426 }
 0x17c   : > { %v474_v21 = vpop.f32.mrb[0].mxu0 }
 0x17d   : > { %v475_v22 = vadd.f32 %v474_v21, %v427_v20  ;;  %v476_v23 = vpop.f32.mrb[1].mxu0 }
 0x17e   : > { %v478_v26 = vpop.f32.mrb[2].mxu0  ;;  %v477_v30 = vadd.f32 %v476_v23, %v427_v20 }
 0x17f   : > { %v1041_v27 = vmax.f32 %v475_v22, 0.0  ;;  %v479_v31 = vpop.f32.mrb[3].mxu0 }
 0x180   : > { %v482_v32 = vmax.f32 %v477_v30, 0.0  ;;  %v607_v31 = vld [vmem:[%s1121_s4] sm:$0xf] }
 0x181   : > { %547 = vrot.lane.b32.xlu0 %v1041_v27, %s826_s7  ;;  %488 = vrot.lane.b32.xlu1 %v1041_v27, %s823_s28 }
 0x185   : > { %500 = vrot.lane.b32.xlu0 %v482_v32, %s822_s27  ;;  %503 = vrot.lane.b32.xlu1 %v1041_v27, %s822_s27 }
 0x189   : > { %515 = vrot.lane.b32.xlu0 %v482_v32, %s824_s29  ;;  %518 = vrot.lane.b32.xlu1 %v1041_v27, %s824_s29 }
 0x18d   : > { %530 = vrot.lane.b32.xlu0 %v482_v32, %s825_s30  ;;  %533 = vrot.lane.b32.xlu1 %v1041_v27, %s825_s30 }
 0x191   : > { %562 = vrot.lane.b32.xlu0 %v1041_v27, %s827_s8  ;;  %484 = vrot.lane.b32.xlu1 %v482_v32, %s823_s28 }
 0x195   : > { %577 = vrot.lane.b32.xlu0 %v1041_v27, %s829_s9  ;;  %549 = vrot.lane.b32.xlu1 %v482_v32, %s826_s7 }
 0x199   : > { %592 = vrot.lane.b32.xlu0 %v1041_v27, %s830_s10  ;;  %564 = vrot.lane.b32.xlu1 %v482_v32, %s827_s8 }
 0x19d   : > { %639 = vperm.xlu0 %813, %v636_v33   ;;  %579 = vrot.lane.b32.xlu1 %v482_v32, %s829_s9  ;;  %s251_s9 = scalar_lea.vmem %s1123_s6, %s794_s23 }
 0x1a1   : > { %594 = vrot.lane.b32.xlu1 %v482_v32, %s830_s10 }
 0x1f3   : > { %v548_v34 = vpop.permute.xlu0 %547  ;;  %v489_v35 = vpop.permute.xlu1 %488 }
 0x1f7   : > { %v501_v36 = vpop.permute.xlu0 %500  ;;  %v504_v37 = vpop.permute.xlu1 %503 }
 0x1f8   : > { %v508_v44 = vsel %vm278_vm0, %v501_v36, %v504_v37  ;;  %v505_v45 = vsel %vm278_vm0, %v504_v37, %v501_v36 }
 0x1f9   : > { %v511_v47 = vmul.f32 %v924_v6, %v508_v44  ;;  %v512_v54 = vmul.f32 %v939_v9, %v505_v45 }
 0x1fb   : > { %v516_v40 = vpop.permute.xlu0 %515  ;;  %v519_v41 = vpop.permute.xlu1 %518 }
 0x1fc   : > { %v520_v49 = vsel %vm295_vm2, %v519_v41, %v516_v40  ;;  %v523_v61 = vsel %vm295_vm2, %v516_v40, %v519_v41 }
 0x1fd   : > { %v527_v6 = vmul.f32 %v957_v25, %v520_v49 }
 0x1ff   : > { %v531_v42 = vpop.permute.xlu0 %530  ;;  %v534_v43 = vpop.permute.xlu1 %533 }
 0x200   : > { %v535_v46 = vsel %vm312_vm3, %v534_v43, %v531_v42  ;;  %v538_v55 = vsel %vm312_vm3, %v531_v42, %v534_v43 }
 0x201   : > { %v542_v58 = vmul.f32 %v969_v29, %v535_v46  ;;  %v541_v4 = vmul.f32 %v964_v28, %v538_v55 }
 0x203   : > { %v485_v48 = vpop.permute.xlu1 %484  ;;  %v563_v62 = vpop.permute.xlu0 %562 }
 0x204   : > { %v490_v50 = vsel %vm262_vm1, %v489_v35, %v485_v48  ;;  %v493_v51 = vsel %vm262_vm1, %v485_v48, %v489_v35 }
 0x205   : > { %v496_v59 = vmul.f32 %v493_v51, %v929_v7  ;;  %v497_v60 = vmul.f32 %v490_v50, %v934_v8  ;;  %v629_v7 = vpack.c.bf16 %v542_v58, %v527_v6  ;;  %v526_v8 = vmul.f32 %v952_v24, %v523_v61 }
 0x207   : > { %v550_v63 = vpop.permute.xlu1 %549  ;;  %v627_v0 = vpack.c.bf16 %v512_v54, %v497_v60  ;;  %v626_v1 = vpack.c.bf16 %v511_v47, %v496_v59  ;;  %v628_v11 = vpack.c.bf16 %v541_v4, %v526_v8  ;;  %v578_v12 = vpop.permute.xlu0 %577 }
 0x208   : > { %v555_v9 = vsel %vm330_vm4, %v550_v63, %v548_v34  ;;  %v551_v5 = vsel %vm330_vm4, %v548_v34, %v550_v63 }
 0x209   : > { %v559_v29 = vmul.f32 %v985_v39, %v555_v9  ;;  %651 = vmatprep.subr.bf16.mxu1 %v627_v0  ;;  %v558_v25 = vmul.f32 %v980_v38, %v551_v5 }
 0x20a   : > { %652 = vmatpush1.bf16.msra.mxu1 %v626_v1 }
 0x20b   : > { %653 = vmatprep.subr.bf16.mxu1 %v629_v7  ;;  %v565_v10 = vpop.permute.xlu1 %564  ;;  %v631_v13 = vpack.c.bf16 %v559_v29, %v482_v32  ;;  %v630_v24 = vpack.c.bf16 %v558_v25, %v1041_v27  ;;  %v593_v20 = vpop.permute.xlu0 %592 }
 0x20c   : > { %v566_v28 = vsel %vm347_vm5, %v563_v62, %v565_v10  ;;  %v570_v14 = vsel %vm347_vm5, %v565_v10, %v563_v62 }
 0x20d   : > { %v573_v17 = vmul.f32 %v996_v52, %v566_v28  ;;  %v574_v38 = vmul.f32 %v1001_v53, %v570_v14 }
 0x20e   : > { %654 = vmatpush1.bf16.msra.mxu1 %v628_v11 }
 0x20f   : > { %655 = vmatprep.subr.bf16.mxu1 %v631_v13  ;;  %v580_v15 = vpop.permute.xlu1 %579 }
 0x210   : > { %v581_v39 = vsel %vm364_vm6, %v578_v12, %v580_v15  ;;  %v585_v16 = vsel %vm364_vm6, %v580_v15, %v578_v12 }
 0x211   : > { %v588_v18 = vmul.f32 %v1008_v56, %v581_v39  ;;  %v589_v19 = vmul.f32 %v1013_v57, %v585_v16 }
 0x212   : > { %656 = vmatpush1.bf16.msra.mxu1 %v630_v24 }
 0x213   : > { %v595_v21 = vpop.permute.xlu1 %594  ;;  %v633_v22 = vpack.c.bf16 %v589_v19, %v574_v38  ;;  %v632_v23 = vpack.c.bf16 %v588_v18, %v573_v17 }
 0x214   : > { %v596_v26 = vsel %vm381_vm7, %v593_v20, %v595_v21  ;;  %v600_v30 = vsel %vm381_vm7, %v595_v21, %v593_v20 }
 0x215   : > { %v603_v27 = vmul.f32 %v1024_v2, %v596_v26  ;;  %v604_v52 = vmul.f32 %v1029_v3, %v600_v30  ;;  %657 = vmatprep.subr.bf16.mxu1 %v633_v22 }
 0x216   : > { %658 = vmatpush1.bf16.msra.mxu1 %v632_v23 }
 0x217   : > { %v634_v53 = vpack.c.bf16 %v603_v27, %v603_v27  ;;  %v635_v56 = vpack.c.bf16 %v604_v52, %v604_v52 }
 0x219   : > { %790 = vmatprep.subr.msk.bf16.mxu1 %vm433_vm8, %v635_v56  ;;  %v646_v57 = vsel %vm433_vm8, %v634_v53, 0 }
 0x21a   : > { %660 = vmatpush1.bf16.msra.mxu1 %v646_v57 }
 0x21c   : > { %v640_v32 = vpop.permute.xlu0 %639 }
 0x21d   : > { %791 = vmatmul.mubr.msk.bf16.vlgmr.msra.gmra.mrb[0].mxu1 %vm429_vm9, %v607_v31 }
 0x2f0   : > { %v685_v33 = vpop.f32.mrb[0].mxu1 }
 0x2f1   : > { %v686_v2 = vadd.f32 %v685_v33, %v640_v32  ;;  %v687_v34 = vpop.f32.mrb[1].mxu1 }
 0x2f2   : > { %v688_v3 = vadd.f32 %v687_v34, %v640_v32  ;;  %v689_v35 = vpop.f32.mrb[2].mxu1 }
 0x2f3   : > { %v692_v36 = vmax.f32 %v686_v2, 0.0  ;;  %v690_v37 = vpop.f32.mrb[3].mxu1 }
 0x2f4   : > { %v693_v40 = vmax.f32 %v688_v3, 0.0 }
 0x2f5   : > { %694 = vst [vmem:[%s251_s9] sm:$0xff] %v692_v36 }
 0x2f6   : > { %695 = vst [vmem:[%s251_s9 + $0x8] sm:$0xff] %v693_v40 }
 0x2f7 PF: > { %s16_s21 = sadd.s32 1, %s820_s21  }
 0x2f8   : > { %p13_p4 = scmp.ge.s32.totalorder %s16_s21, 4  }
 0x2fa   :  { %15 = sbr.rel (!%p13_p4) target bundleno = 1 (0x1), region = 81 }

</bundles_post_ra>
